<compile_context>
chip_gen: v5e
topology: v5e:2x2
jax: 0.10.0
libtpu: 0.0.40
codegen_flags: <defaults>
</compile_context>

<pallas_src>
import jax
import jax.numpy as jnp
from jax.experimental import pallas as pl
from jax.experimental.pallas import tpu as pltpu

_EPS = 1e-5


def _round_up(x, m):
    return ((x + m - 1) // m) * m


# ----------------------------------------------------------------------------
# Kernel: fused GEMM (ConvTranspose as depth-to-space GEMM) + BN bias + SiLU
# ----------------------------------------------------------------------------
def _deconv_mm_bn_silu_kernel(x_ref, w_ref, b_ref, o_ref):
    # x_ref: (TM, Cin) bf16   w_ref: (Cin, KC) bf16 (BN scale pre-folded)
    # b_ref: (1, KC)   f32    o_ref: (TM, KC) bf16
    y = jnp.dot(x_ref[...], w_ref[...], preferred_element_type=jnp.float32)
    y = y + b_ref[...]                                  # folded BN bias (f32)
    # SiLU: y * sigmoid(y); exp -> EUP, reciprocal(approx) -> EUP, keeps VALU free.
    sig = pl.reciprocal(1.0 + jnp.exp(-y), approx=True)
    o_ref[...] = (y * sig).astype(o_ref.dtype)


# ----------------------------------------------------------------------------
# Per-generation VMEM budget & tile sizing
# ----------------------------------------------------------------------------
def _vmem_budget():
    try:
        cap = pltpu.get_tpu_info().vmem_capacity_bytes
    except Exception:  # pragma: no cover - conservative fallback
        cap = 64 * 1024 * 1024
    small_vmem = cap <= 64 * 1024 * 1024  # v7x-class: 64 MiB/TC, 2 TCs/chip
    budget = (40 if small_vmem else 96) * 1024 * 1024
    limit = (48 if small_vmem else 112) * 1024 * 1024
    return budget, limit, small_vmem


def _pick_tm(m, cin, kc, bytes_x, bytes_o, bytes_w, budget, want_two_steps,
             tm_max=2048):
    # footprint(TM) ~= 2*TM*cin*bytes_x + 2*TM*kc*bytes_o   (double-buffered x/out)
    #               + 2*cin*kc*bytes_w + 2*kc*4              (resident weights+bias)
    fixed = 2 * cin * kc * bytes_w + 2 * kc * 4
    per_row = 2 * cin * bytes_x + 2 * kc * bytes_o
    tm = max(16, (budget - fixed) // per_row)
    tm = min(tm, tm_max, _round_up(m, 16))
    if want_two_steps and m > 16:
        # Give both v7x TensorCores work even for small feature maps.
        tm = min(tm, _round_up(pl.cdiv(m, 2), 16))
    return max(16, (tm // 16) * 16)  # multiple of 16 for bf16 sublane packing


def _matmul_bn_silu(x2, w2, b2, out_dtype=jnp.bfloat16):
    """x2: (M, Cin) bf16, w2: (Cin, KC) bf16 (scale folded), b2: (1, KC) f32."""
    m, cin = x2.shape
    kc = w2.shape[1]
    budget, vmem_limit, small_vmem = _vmem_budget()
    tm = _pick_tm(m, cin, kc, x2.dtype.itemsize, jnp.dtype(out_dtype).itemsize,
                  w2.dtype.itemsize, budget, want_two_steps=small_vmem)
    mp = pl.cdiv(m, tm) * tm
    if mp != m:
        x2 = jnp.pad(x2, ((0, mp - m), (0, 0)))  # zero rows, sliced off below
    grid = (mp // tm,)
    out = pl.pallas_call(
        _deconv_mm_bn_silu_kernel,
        out_shape=jax.ShapeDtypeStruct((mp, kc), out_dtype),
        grid=grid,
        in_specs=[
            pl.BlockSpec((tm, cin), lambda i: (i, 0)),   # activations: tiled over M
            pl.BlockSpec((cin, kc), lambda i: (0, 0)),   # weights: resident
            pl.BlockSpec((1, kc), lambda i: (0, 0)),     # BN bias (f32)
        ],
        out_specs=pl.BlockSpec((tm, kc), lambda i: (i, 0)),
        compiler_params=pltpu.CompilerParams(
            dimension_semantics=("parallel",),           # megacore-shardable
            vmem_limit_bytes=vmem_limit,
        ),
    )(x2, w2, b2)
    return out[:m] if mp != m else out


# ----------------------------------------------------------------------------
# Parameter setup (inference-mode BatchNorm folded into scale/bias)
# ----------------------------------------------------------------------------
def init_convtranspose_params(key, c1, c2, k=2, eps=_EPS):
    keys = jax.random.split(key, 5)
    # PyTorch ConvTranspose2d weight layout: (c1, c2, kH, kW), bias=False (bn=True)
    w = 0.1 * jax.random.normal(keys[0], (c1, c2, k, k), jnp.float32)
    gamma = 1.0 + 0.1 * jax.random.normal(keys[1], (c2,), jnp.float32)
    beta = 0.1 * jax.random.normal(keys[2], (c2,), jnp.float32)
    mean = 0.1 * jax.random.normal(keys[3], (c2,), jnp.float32)
    var = 0.5 + jnp.abs(jax.random.normal(keys[4], (c2,), jnp.float32))
    scale = gamma / jnp.sqrt(var + eps)
    bias = beta - mean * scale
    return {"w": w, "scale": scale, "bias": bias}


# ----------------------------------------------------------------------------
# ConvTranspose forward (NCHW in, NCHW out by default to match PyTorch module)
# ----------------------------------------------------------------------------
def conv_transpose_forward(x_nchw, params, stride=2, padding=0,
                           out_dtype=jnp.bfloat16, nhwc_out=False):
    w = params["w"]
    n, cin, h, wd = x_nchw.shape
    cout, k = w.shape[1], w.shape[2]
    if k != stride or padding != 0:
        # TODO(synk): overlapping-stride / padded ConvTranspose needs a scatter-add
        # formulation; only the module default (k == s, p == 0) is implemented.
        raise NotImplementedError("only k == s, p == 0 ConvTranspose is supported")

    m = n * h * wd
    kc = k * k * cout
    # NOTE: MXU contraction dim is Cin; for production YOLO shapes Cin >= 128 and
    # kc a multiple of 128 keep the systolic array busy.  Toy shapes are DMA-bound.

    # NCHW -> NHWC -> (M, Cin), bf16 activations (f32 accumulation in-kernel).
    x2 = jnp.transpose(x_nchw, (0, 2, 3, 1)).reshape(m, cin).astype(jnp.bfloat16)

    # Weight: (Cin, Cout, k, k) -> (Cin, k*k*Cout); column (a*k+b)*Cout+co == W[ci,co,a,b].
    w2 = jnp.transpose(w, (0, 2, 3, 1)).reshape(cin, kc)
    s2 = jnp.tile(params["scale"], k * k).reshape(1, kc)
    b2 = jnp.tile(params["bias"], k * k).reshape(1, kc).astype(jnp.float32)
    # Fold BN scale into the weights in f32, then cast for the MXU.
    w2 = (w2 * s2)

    # Pad the lane (output) dim to a multiple of 128 for unmasked, lane-dense stores.
    kc_pad = max(128, _round_up(kc, 128))
    if kc_pad != kc:
        w2 = jnp.pad(w2, ((0, 0), (0, kc_pad - kc)))
        b2 = jnp.pad(b2, ((0, 0), (0, kc_pad - kc)))
    w2 = w2.astype(jnp.bfloat16)

    y = _matmul_bn_silu(x2, w2, b2, out_dtype=out_dtype)      # (M, kc_pad)
    if kc_pad != kc:
        y = y[:, :kc]

    # depth-to-space: (N,H,W,k,k,Cout) -> (N, k*H, k*W, Cout)
    y = y.reshape(n, h, wd, k, k, cout)
    y = jnp.transpose(y, (0, 1, 3, 2, 4, 5)).reshape(n, k * h, k * wd, cout)
    if nhwc_out:
        return y  # preferred for downstream layers (avoids an extra HBM round trip)
    return jnp.transpose(y, (0, 3, 1, 2))


# ----------------------------------------------------------------------------
# Pure-JAX reference (independent path via lax.conv_general_dilated, f32)
# ----------------------------------------------------------------------------
def conv_transpose_reference(x_nchw, params, stride=2, padding=0):
    w = params["w"]
    k = w.shape[2]
    x = jnp.transpose(x_nchw, (0, 2, 3, 1))  # NHWC
    # ConvTranspose == lhs-dilated conv with spatially-flipped kernel, HWIO layout
    rhs = jnp.transpose(w[:, :, ::-1, ::-1], (2, 3, 0, 1))     # (kH,kW,Cin,Cout)
    y = jax.lax.conv_general_dilated(
        x,
        rhs,
        window_strides=(1, 1),
        padding=[(k - 1 - padding, k - 1 - padding)] * 2,
        lhs_dilation=(stride, stride),
        dimension_numbers=("NHWC", "HWIO", "NHWC"),
    )
    y = y * params["scale"] + params["bias"]
    y = y * jax.nn.sigmoid(y)
    return jnp.transpose(y, (0, 3, 1, 2))


if __name__ == "__main__":
    key = jax.random.PRNGKey(0)
    kx, kp = jax.random.split(key)

    N, C1, H, W = 2, 4, 16, 16
    C2 = 8
    x = jax.random.normal(kx, (N, C1, H, W), jnp.float32)
    params = init_convtranspose_params(kp, C1, C2, k=2)

    out = conv_transpose_forward(x, params)
    out = jax.block_until_ready(out)

    ref = conv_transpose_reference(x, params)
    assert out.shape == (N, C2, 2 * H, 2 * W), out.shape
    diff = jnp.max(jnp.abs(out.astype(jnp.float32) - ref))
    # bf16 I/O + approx reciprocal -> looser tolerance than pure f32.
    assert jnp.allclose(out.astype(jnp.float32), ref, rtol=2e-2, atol=2e-2), float(diff)
    print("KERNEL_OK")
</pallas_src>

<mosaic_0001>
module attributes {stable_mosaic.version = 11 : i64} {
  func.func @_deconv_mm_bn_silu_kernel(%arg0: i32, %arg1: memref<256x4xbf16, #tpu.memory_space<vmem>>, %arg2: memref<4x128xbf16, #tpu.memory_space<vmem>>, %arg3: memref<1x128xf32, #tpu.memory_space<vmem>>, %arg4: memref<256x128xbf16, #tpu.memory_space<vmem>>) attributes {dimension_semantics = [#tpu.dimension_semantics<parallel>], iteration_bounds = array<i64: 2>, scalar_prefetch = 0 : i64, scratch_operands = 0 : i64, tpu.core_type = #tpu.core_type<tc>, window_params = [{transform_indices = @transform_0, window_bounds = array<i64: 256, 4>}, {pipeline_mode = #tpu.pipeline_mode<synchronous>, transform_indices = @transform_1, window_bounds = array<i64: 4, 128>}, {pipeline_mode = #tpu.pipeline_mode<synchronous>, transform_indices = @transform_2, window_bounds = array<i64: 1, 128>}, {transform_indices = @transform_3, window_bounds = array<i64: 256, 128>}]} {
    %c0 = arith.constant 0 : index
    %c0_0 = arith.constant 0 : index
    %0 = vector.load %arg1[%c0, %c0_0] : memref<256x4xbf16, #tpu.memory_space<vmem>>, vector<256x4xbf16>
    %c0_1 = arith.constant 0 : index
    %c0_2 = arith.constant 0 : index
    %1 = vector.load %arg2[%c0_1, %c0_2] : memref<4x128xbf16, #tpu.memory_space<vmem>>, vector<4x128xbf16>
    %cst = arith.constant dense<0.000000e+00> : vector<256x128xf32>
    %2 = tpu.matmul %0, %1, %cst {dimension_numbers = #tpu.dot_dimension_numbers<[1], [0], [0], [1], [0, 0, 1, 1], [], []>} : vector<256x4xbf16>, vector<4x128xbf16>, vector<256x128xf32> -> vector<256x128xf32>
    %c0_3 = arith.constant 0 : index
    %c0_4 = arith.constant 0 : index
    %3 = vector.load %arg3[%c0_3, %c0_4] : memref<1x128xf32, #tpu.memory_space<vmem>>, vector<1x128xf32>
    %4 = vector.broadcast %3 : vector<1x128xf32> to vector<256x128xf32>
    %5 = arith.addf %2, %4 : vector<256x128xf32>
    %cst_5 = arith.constant 0.000000e+00 : f32
    %6 = vector.broadcast %cst_5 : f32 to vector<256x128xf32>
    %7 = arith.subf %6, %5 : vector<256x128xf32>
    %8 = math.exp %7 : vector<256x128xf32>
    %cst_6 = arith.constant 1.000000e+00 : f32
    %9 = vector.broadcast %cst_6 : f32 to vector<256x128xf32>
    %10 = arith.addf %9, %8 : vector<256x128xf32>
    %11 = tpu.reciprocal %10 {approx = true} : vector<256x128xf32> -> vector<256x128xf32>
    %12 = arith.mulf %5, %11 : vector<256x128xf32>
    %13 = arith.truncf %12 : vector<256x128xf32> to vector<256x128xbf16>
    %c0_7 = arith.constant 0 : index
    %c0_8 = arith.constant 0 : index
    %14 = vector.load %arg4[%c0_7, %c0_8] : memref<256x128xbf16, #tpu.memory_space<vmem>>, vector<256x128xbf16>
    tpu.vector_store %arg4[%c0_7, %c0_8], %13 {strides = array<i32>} : memref<256x128xbf16, #tpu.memory_space<vmem>>, vector<256x128xbf16>,
    return
  }
  func.func @transform_0(%arg0: i32) -> (i32, i32) {
    %c0_i32 = arith.constant 0 : i32
    %c0_i32_0 = arith.constant 0 : i32
    return %arg0, %c0_i32 : i32, i32
  }
  func.func @transform_1(%arg0: i32) -> (i32, i32) {
    %c0_i32 = arith.constant 0 : i32
    %c0_i32_0 = arith.constant 0 : i32
    %c0_i32_1 = arith.constant 0 : i32
    return %c0_i32, %c0_i32_0 : i32, i32
  }
  func.func @transform_2(%arg0: i32) -> (i32, i32) {
    %c0_i32 = arith.constant 0 : i32
    %c0_i32_0 = arith.constant 0 : i32
    %c0_i32_1 = arith.constant 0 : i32
    return %c0_i32, %c0_i32_0 : i32, i32
  }
  func.func @transform_3(%arg0: i32) -> (i32, i32) {
    %c0_i32 = arith.constant 0 : i32
    %c0_i32_0 = arith.constant 0 : i32
    return %arg0, %c0_i32 : i32, i32
  }
}

</mosaic_0001>

<bundles_post_ra>
// kernel: tpu_custom_call.1
= control target key start
LH: loop header
LB: loop body
LE: loop exit
PB: predicated region body
PF: predicated region fallthrough
CT: control target
= control target key end

     0   :  { %8 = vsyncpa [#allocation3], 0  ;;  %s1526_s0 = inlined_call_operand.vmem [shape: bf16[512,4], index: 0, kind: input, shape index: {}]   ;;  %s1527_s1 = inlined_call_operand.vmem [shape: bf16[4,128], index: 1, kind: input, shape index: {}]   ;;  %s1528_s2 = inlined_call_operand.vmem [shape: f32[1,128], index: 2, kind: input, shape index: {}]   ;;  %s1529_s3 = inlined_call_operand.hbm [shape: bf16[512,128], index: 3, kind: output, shape index: {}]  }
   0x1   :  { %10 = vsyncpa [#allocation3 + $0x1], 0  ;;  %s1229_s12 = smov 0   ;;  %s1231_s13 = smov 0  }
   0x2   :  { %s1233_s14 = smov 0   ;;  %s1235_s15 = smov 0  }
   0x3 LB: > { %s1250_s16 = sadd.s32 4294967295, %s1205_s15   ;;  %s766_s17 = sadd.s32 4294967294, %s1205_s15   ;;  %s1205_s15 = sphi %s1235_s15, %s1535_s15   ;;  %s1201_s14 = sphi %s1233_s14, %s1534_s14   ;;  %s1197_s13 = sphi %s1231_s13, %s1533_s13   ;;  %s1193_s12 = sphi %s1229_s12, %s1532_s12  }
   0x4   : > { %s1254_s18 = sadd.s32 1, %s1205_s15   ;;  %s91_s19 = sadd.s32 1, %s1201_s14 }
   0x5   : > { %s88_s20 = ssub.s32 %s1205_s15, %s1254_s18  ;;  %p101_p0 = scmp.ne.s32.totalorder %s1201_s14, %s1197_s13 }
   0x6   : > { %p89_p1 = scmp.eq.s32.totalorder %s88_s20, 0  ;;  %p102_p2 = scmp.eq.s32.totalorder %s1250_s16, 1 }
   0x7   : > { %p107_p3 = scmp.ne.s32.totalorder %s1197_s13, %s1193_s12  ;;  %p108_p4 = scmp.eq.s32.totalorder %s766_s17, 1 }
   0x8   : > { %s1265_s21 = scalar_select %p89_p1, %s1201_s14, %s91_s19  }
   0x9   : > { %p1267_p5 = por %p102_p2, %p101_p0  ;;  %p1271_p6 = por %p108_p4, %p107_p3 }
   0xa   : > { %p769_p7 = scmp.ge.s32.totalorder %s1205_s15, 1  ;;  %p141_p8 = scmp.lt.s32.totalorder %s1205_s15, 3 }
   0xc   : > { %p142_p9 = pnand %p769_p7, %p141_p8 }
   0xd   : > { %s771_s26 = sshll.u32 (!%p142_p9), %s1250_s16, 5  ;;  %s162_s6 = sand.u32 (!%p142_p9), 1, %s1197_s13  }
   0xe   : > { %145 = sbr.rel (%p142_p9) target bundleno = 250 (0xfa), region = 32  ;;  %p166_p10 = scmp.lt.s32.totalorder (!%p142_p9), %s771_s26, 63 }
   0xf   : > { %s1364_s7 = sshll.u32 (!%p142_p9), %s162_s6, 7  ;;  %s874_s9 = sshll.u32 (!%p142_p9), %s1250_s16, 7 }
  0x10   : > { %s1388_s8 = scalar_lea.vmem (!%p142_p9), [#allocation2], %s1364_s7  ;;  %s700_s17 = scalar_lea.hbm (!%p142_p9), %s1529_s3, %s874_s9 }
  0x11   : > { %s701_s16 = sshll.u32 (!%p142_p9), %s1388_s8, 4  ;;  %s703_s19 = sshll.u32 (!%p142_p9), %s700_s17, 4  ;;  %s702_s16 = int_to_ptr.vmem [resolvable:$true] %s701_s16  ;;  %s704_s19 = int_to_ptr.hbm [resolvable:$true] %s703_s19 }
  0x12   : > { %s689_s20 = scalar_lea.sflag (!%p142_p9), [#allocation3], %s162_s6  ;;  %s1157_s24 = sshra.s32 (!%p142_p9), %s704_s19, 4  ;;  %s1158_s24 = int_to_ptr.hbm [resolvable:$true] %s1157_s24 }
  0x13   : > { %v205_v0 = vld [vmem:[%s1527_s1] sm:$0x3]  ;;  %vm339_vm0 = vcmask 1041408   ;;  %s1537_s26 = smov (!%p166_p10, %s771_s26), 63  ;;  %vm290_vm1 = vcmask 31744   ;;  %s1159_s25 = scalar_lea.hbm %s1158_s24, 128 }
  0x14   : > { %v341_v1 = vsel %vm339_vm0, %v205_v0, 0  ;;  %s772_s27 = sshll.u32 %s1537_s26, 2  ;;  %v1303_v18 = vld [vmem:[%s1528_s2] ss:$0 sm:$0xff]  ;;  %p1160_p11 = scmp.ne.s32.totalorder %s1158_s24, %s1159_s25 }
  0x15   : > { %350 = vmatpush.bf16.msra.mxu0 %v341_v1  ;;  %970 = vmatpush.bf16.msra.mxu1 %v341_v1  ;;  %s169_s30 = scalar_lea.vmem %s1526_s0, %s772_s27  ;;  %s1163_s28 = scalar_lea.hbm %s1529_s3, 256 }
  0x16   : > { %971 = vmatpush.bf16.msra.mxu2 %v341_v1  ;;  %972 = vmatpush.bf16.msra.mxu3 %v341_v1  ;;  %v858_v2 = vld [vmem:[%s169_s30] sm:$0xff]  ;;  %v859_v6 = vld [vmem:[%s169_s30 + $0x8] sm:$0xff]  ;;  %v860_v10 = vld [vmem:[%s169_s30 + $0x10] sm:$0xff]  ;;  %p1161_p12 = pnand %p1160_p11, %p1267_p5  ;;  %p1164_p0 = scmp.lt.s32.totalorder %s1158_s24, %s1529_s3 }
  0x17   : > { %v862_v3 = vld [vmem:[%s169_s30 + $0x20] sm:$0xff]  ;;  %v863_v7 = vld [vmem:[%s169_s30 + $0x28] sm:$0xff]  ;;  %v864_v11 = vld [vmem:[%s169_s30 + $0x30] sm:$0xff]  ;;  %p1165_p1 = scmp.lt.s32.totalorder %s1163_s28, %s1159_s25 }
  0x18   : > { %v866_v4 = vld [vmem:[%s169_s30 + $0x40] sm:$0xff]  ;;  %837 = vmatmul.msk.bf16.vlgmr.msra.gmra.mxu0 %vm290_vm1, %v858_v2  ;;  %841 = vmatmul.msk.bf16.vlgmr.msra.gmra.mxu1 %vm290_vm1, %v862_v3  ;;  %v867_v8 = vld [vmem:[%s169_s30 + $0x48] sm:$0xff]  ;;  %v868_v12 = vld [vmem:[%s169_s30 + $0x50] sm:$0xff]  ;;  %p1162_p13 = pneg %p1161_p12 }
  0x19   : > { %v870_v5 = vld [vmem:[%s169_s30 + $0x60] sm:$0xff]  ;;  %845 = vmatmul.msk.bf16.vlgmr.msra.gmra.mxu2 %vm290_vm1, %v866_v4  ;;  %v871_v9 = vld [vmem:[%s169_s30 + $0x68] sm:$0xff]  ;;  %v872_v13 = vld [vmem:[%s169_s30 + $0x70] sm:$0xff]  ;;  %p1166_p2 = por %p1165_p1, %p1164_p0 }
  0x1a   : > { %849 = vmatmul.msk.bf16.vlgmr.msra.gmra.mxu3 %vm290_vm1, %v870_v5  ;;  %v861_v14 = vld [vmem:[%s169_s30 + $0x18] sm:$0xff] }
  0x1b   : > { %v865_v15 = vld [vmem:[%s169_s30 + $0x38] sm:$0xff]  ;;  %p1167_p3 = pnand %p1166_p2, %p1162_p13 }
  0x1c   : > { %v869_v16 = vld [vmem:[%s169_s30 + $0x58] sm:$0xff] }
  0x1d   : > { %v873_v17 = vld [vmem:[%s169_s30 + $0x78] sm:$0xff] }
  0x28   : > { %838 = vmatmul.msk.bf16.gmra.mxu0 %vm290_vm1, %v859_v6  ;;  %842 = vmatmul.msk.bf16.gmra.mxu1 %vm290_vm1, %v863_v7 }
  0x29   : > { %846 = vmatmul.msk.bf16.gmra.mxu2 %vm290_vm1, %v867_v8 }
  0x2a   : > { %850 = vmatmul.msk.bf16.gmra.mxu3 %vm290_vm1, %v871_v9 }
  0x38   : > { %839 = vmatmul.msk.bf16.gmra.mxu0 %vm290_vm1, %v860_v10  ;;  %843 = vmatmul.msk.bf16.gmra.mxu1 %vm290_vm1, %v864_v11 }
  0x39   : > { %847 = vmatmul.msk.bf16.gmra.mxu2 %vm290_vm1, %v868_v12 }
  0x3a   : > { %851 = vmatmul.msk.bf16.gmra.mxu3 %vm290_vm1, %v872_v13 }
  0x48   : > { %840 = vmatmul.msk.bf16.gmra.mxu0 %vm290_vm1, %v861_v14  ;;  %844 = vmatmul.msk.bf16.gmra.mxu1 %vm290_vm1, %v865_v15 }
  0x49   : > { %848 = vmatmul.msk.bf16.gmra.mxu2 %vm290_vm1, %v869_v16 }
  0x4a   : > { %852 = vmatmul.msk.bf16.gmra.mxu3 %vm290_vm1, %v873_v17 }
  0x95   : > { %v352_v19 = vpop.f32.mrf.mxu0  ;;  %v372_v20 = vpop.f32.mrf.mxu1 }
  0x96   : > { %v1306_v21 = vadd.f32 %v1303_v18, %v352_v19  ;;  %v1309_v22 = vadd.f32 %v1303_v18, %v372_v20 }
  0x98   : > { %v432_v23 = vsub.f32 0.0, %v1306_v21  ;;  %v440_v24 = vsub.f32 0.0, %v1309_v22 }
  0x9a   : > { %v464_v25 = vmul.f32 1.442695, %v432_v23  ;;  %v480_v26 = vmul.f32 1.442695, %v440_v24 }
  0x9c   : > { %1015 = vpow2.f32 %v464_v25  ;;  %v392_v27 = vpop.f32.mrf.mxu2 }
  0x9d   : > { %v412_v28 = vpop.f32.mrf.mxu3  ;;  %1017 = vpow2.f32 %v480_v26  ;;  %v1314_v29 = vadd.f32 %v1303_v18, %v392_v27  ;;  %v354_v31 = vpop.f32.mrf.mxu0 }
  0x9e   : > { %v1317_v30 = vadd.f32 %v1303_v18, %v412_v28  ;;  %v374_v32 = vpop.f32.mrf.mxu1  ;;  %v1320_v33 = vadd.f32 %v1303_v18, %v354_v31 }
  0x9f   : > { %v1323_v34 = vadd.f32 %v1303_v18, %v374_v32  ;;  %v448_v35 = vsub.f32 0.0, %v1314_v29 }
  0xa0   : > { %v456_v36 = vsub.f32 0.0, %v1317_v30  ;;  %v433_v37 = vsub.f32 0.0, %v1320_v33 }
  0xa1   : > { %v441_v38 = vsub.f32 0.0, %v1323_v34  ;;  %v496_v39 = vmul.f32 1.442695, %v448_v35 }
  0xa2   : > { %v512_v40 = vmul.f32 1.442695, %v456_v36  ;;  %v1016_v41 = vpop.eup %1015  ;;  %v466_v43 = vmul.f32 1.442695, %v433_v37 }
  0xa3   : > { %v1018_v42 = vpop.eup %1017  ;;  %1019 = vpow2.f32 %v496_v39  ;;  %v482_v44 = vmul.f32 1.442695, %v441_v38  ;;  %v528_v47 = vadd.f32 1.0, %v1016_v41 }
  0xa4   : > { %1021 = vpow2.f32 %v512_v40  ;;  %v394_v45 = vpop.f32.mrf.mxu2  ;;  %v536_v52 = vadd.f32 1.0, %v1018_v42 }
  0xa5   : > { %v414_v46 = vpop.f32.mrf.mxu3  ;;  %v1330_v48 = vadd.f32 %v1303_v18, %v394_v45  ;;  %v357_v50 = vpop.f32.mrf.mxu0  ;;  %1023 = vpow2.f32 %v466_v43 }
  0xa6   : > { %v1333_v49 = vadd.f32 %v1303_v18, %v414_v46  ;;  %v377_v51 = vpop.f32.mrf.mxu1  ;;  %v1336_v53 = vadd.f32 %v1303_v18, %v357_v50  ;;  %1025 = vpow2.f32 %v482_v44 }
  0xa7   : > { %v1339_v54 = vadd.f32 %v1303_v18, %v377_v51  ;;  %v449_v55 = vsub.f32 0.0, %v1330_v48  ;;  %1027 = vrcp.f32 %v528_v47 }
  0xa8   : > { %v457_v56 = vsub.f32 0.0, %v1333_v49  ;;  %v434_v57 = vsub.f32 0.0, %v1336_v53  ;;  %1029 = vrcp.f32 %v536_v52 }
  0xa9   : > { %v1020_v58 = vpop.eup %1019  ;;  %v498_v59 = vmul.f32 1.442695, %v449_v55  ;;  %v442_v60 = vsub.f32 0.0, %v1339_v54 }
  0xaa   : > { %v1022_v61 = vpop.eup %1021  ;;  %v544_v62 = vadd.f32 1.0, %v1020_v58  ;;  %v514_v63 = vmul.f32 1.442695, %v457_v56  ;;  %v468_v1 = vmul.f32 1.442695, %v434_v57 }
  0xab   : > { %v552_v0 = vadd.f32 1.0, %v1022_v61  ;;  %1031 = vpow2.f32 %v498_v59  ;;  %v1024_v4 = vpop.eup %1023  ;;  %v484_v5 = vmul.f32 1.442695, %v442_v60 }
  0xac   : > { %1033 = vrcp.f32 %v544_v62  ;;  %v397_v2 = vpop.f32.mrf.mxu2  ;;  %v1026_v10 = vpop.eup %1025  ;;  %v529_v11 = vadd.f32 1.0, %v1024_v4 }
  0xad   : > { %v417_v3 = vpop.f32.mrf.mxu3  ;;  %1035 = vrcp.f32 %v552_v0  ;;  %v1346_v6 = vadd.f32 %v1303_v18, %v397_v2  ;;  %v359_v8 = vpop.f32.mrf.mxu0  ;;  %v537_v15 = vadd.f32 1.0, %v1026_v10 }
  0xae   : > { %v1349_v7 = vadd.f32 %v1303_v18, %v417_v3  ;;  %v379_v9 = vpop.f32.mrf.mxu1  ;;  %1037 = vpow2.f32 %v514_v63  ;;  %v1352_v12 = vadd.f32 %v1303_v18, %v359_v8  ;;  %v1028_v14 = vpop.eup %1027 }
  0xaf   : > { %v1355_v13 = vadd.f32 %v1303_v18, %v379_v9  ;;  %1039 = vpow2.f32 %v468_v1  ;;  %v450_v16 = vsub.f32 0.0, %v1346_v6  ;;  %v1030_v19 = vpop.eup %1029  ;;  %v592_v46 = vmul.f32 %v1028_v14, %v1306_v21 }
  0xb0   : > { %v458_v17 = vsub.f32 0.0, %v1349_v7  ;;  %1041 = vrcp.f32 %v529_v11  ;;  %v435_v20 = vsub.f32 0.0, %v1352_v12  ;;  %v600_v58 = vmul.f32 %v1030_v19, %v1309_v22 }
  0xb1   : > { %v443_v23 = vsub.f32 0.0, %v1355_v13  ;;  %v1032_v24 = vpop.eup %1031  ;;  %1043 = vrcp.f32 %v537_v15  ;;  %v500_v25 = vmul.f32 1.442695, %v450_v16 }
  0xb2   : > { %v516_v26 = vmul.f32 1.442695, %v458_v17  ;;  %v1034_v27 = vpop.eup %1033  ;;  %v545_v28 = vadd.f32 1.0, %v1032_v24  ;;  %1045 = vpow2.f32 %v484_v5  ;;  %v470_v31 = vmul.f32 1.442695, %v435_v20 }
  0xb3   : > { %v1036_v32 = vpop.eup %1035  ;;  %1047 = vpow2.f32 %v500_v25  ;;  %v486_v36 = vmul.f32 1.442695, %v443_v23  ;;  %v608_v1 = vmul.f32 %v1034_v27, %v1314_v29 }
  0xb4   : > { %v1038_v35 = vpop.eup %1037  ;;  %1049 = vrcp.f32 %v545_v28  ;;  %v399_v37 = vpop.f32.mrf.mxu2  ;;  %v616_v22 = vmul.f32 %v1036_v32, %v1317_v30 }
  0xb5   : > { %v419_v38 = vpop.f32.mrf.mxu3  ;;  %v1040_v39 = vpop.eup %1039  ;;  %v553_v40 = vadd.f32 1.0, %v1038_v35  ;;  %1051 = vpow2.f32 %v516_v26  ;;  %v1367_v41 = vadd.f32 %v1303_v18, %v399_v37 }
  0xb6   : > { %v1370_v42 = vadd.f32 %v1303_v18, %v419_v38  ;;  %v362_v43 = vpop.f32.mrf.mxu0  ;;  %v382_v44 = vpop.f32.mrf.mxu1  ;;  %v530_v47 = vadd.f32 1.0, %v1040_v39  ;;  %1053 = vpow2.f32 %v470_v31 }
  0xb7   : > { %v1042_v45 = vpop.eup %1041  ;;  %v1374_v50 = vadd.f32 %v1303_v18, %v362_v43  ;;  %1055 = vrcp.f32 %v553_v40  ;;  %v451_v55 = vsub.f32 0.0, %v1367_v41  ;;  %v1379_v56 = vadd.f32 %v1303_v18, %v382_v44 }
  0xb8   : > { %v1044_v51 = vpop.eup %1043  ;;  %v593_v52 = vmul.f32 %v1042_v45, %v1320_v33  ;;  %v459_v59 = vsub.f32 0.0, %v1370_v42  ;;  %1057 = vpow2.f32 %v486_v36 }
  0xb9   : > { %v1046_v57 = vpop.eup %1045  ;;  %v601_v21 = vmul.f32 %v1044_v51, %v1323_v34  ;;  %v436_v60 = vsub.f32 0.0, %v1374_v50  ;;  %v502_v33 = vmul.f32 1.442695, %v451_v55  ;;  %1059 = vrcp.f32 %v530_v47 }
  0xba   : > { %v1048_v61 = vpop.eup %1047  ;;  %v878_v62 = vpack.c.bf16 %v593_v52, %v592_v46  ;;  %v538_v63 = vadd.f32 1.0, %v1046_v57  ;;  %v444_v5 = vsub.f32 0.0, %v1379_v56  ;;  %v518_v9 = vmul.f32 1.442695, %v459_v59 }
  0xbb   : > { %v1050_v0 = vpop.eup %1049  ;;  %v898_v2 = vpack.c.bf16 %v601_v21, %v600_v58  ;;  %v546_v3 = vadd.f32 1.0, %v1048_v61  ;;  %v472_v10 = vmul.f32 1.442695, %v436_v60 }
  0xbc   : > { %v1052_v4 = vpop.eup %1051  ;;  %879 = vst [vmem:[%s1388_s8] sm:$0xff] %v878_v62   ;;  %v609_v34 = vmul.f32 %v1050_v0, %v1330_v48  ;;  %1061 = vrcp.f32 %v538_v63  ;;  %v402_v11 = vpop.f32.mrf.mxu2  ;;  %v488_v26 = vmul.f32 1.442695, %v444_v5 }
  0xbd   : > { %v1054_v8 = vpop.eup %1053  ;;  %958 = vst [vmem:[%s1388_s8 + $0x20] sm:$0xff] %v898_v2   ;;  %1063 = vrcp.f32 %v546_v3  ;;  %v554_v29 = vadd.f32 1.0, %v1052_v4  ;;  %v422_v14 = vpop.f32.mrf.mxu3  ;;  %v1395_v17 = vadd.f32 %v1303_v18, %v402_v11 }
  0xbe   : > { %v1056_v30 = vpop.eup %1055  ;;  %v918_v15 = vpack.c.bf16 %v609_v34, %v608_v1  ;;  %v531_v16 = vadd.f32 1.0, %v1054_v8  ;;  %1065 = vpow2.f32 %v502_v33  ;;  %v364_v48 = vpop.f32.mrf.mxu0  ;;  %v1399_v23 = vadd.f32 %v1303_v18, %v422_v14 }
  0xbf   : > { %v384_v19 = vpop.f32.mrf.mxu1  ;;  %v617_v20 = vmul.f32 %v1056_v30, %v1333_v49  ;;  %1067 = vrcp.f32 %v554_v29  ;;  %v1402_v24 = vadd.f32 %v1303_v18, %v364_v48  ;;  %v1058_v25 = vpop.eup %1057  ;;  %v452_v27 = vsub.f32 0.0, %v1395_v17 }
  0xc0   : > { %962 = vst [vmem:[%s1388_s8 + $0x40] sm:$0xff] %v918_v15   ;;  %1069 = vrcp.f32 %v531_v16  ;;  %v1407_v28 = vadd.f32 %v1303_v18, %v384_v19  ;;  %v1060_v31 = vpop.eup %1059  ;;  %v539_v49 = vadd.f32 1.0, %v1058_v25  ;;  %v460_v35 = vsub.f32 0.0, %v1399_v23 }
  0xc1   : > { %v938_v32 = vpack.c.bf16 %v617_v20, %v616_v22  ;;  %1071 = vpow2.f32 %v518_v9  ;;  %v504_v37 = vmul.f32 1.442695, %v452_v27  ;;  %v437_v38 = vsub.f32 0.0, %v1402_v24 }
  0xc2   : > { %v1062_v36 = vpop.eup %1061  ;;  %1073 = vpow2.f32 %v472_v10  ;;  %v445_v39 = vsub.f32 0.0, %v1407_v28  ;;  %v520_v43 = vmul.f32 1.442695, %v460_v35  ;;  %v594_v58 = vmul.f32 %v1060_v31, %v1336_v53 }
  0xc3   : > { %v1064_v40 = vpop.eup %1063  ;;  %966 = vst [vmem:[%s1388_s8 + $0x60] sm:$0xff] %v938_v32   ;;  %1075 = vrcp.f32 %v539_v49  ;;  %v474_v45 = vmul.f32 1.442695, %v437_v38  ;;  %v602_v8 = vmul.f32 %v1062_v36, %v1339_v54 }
  0xc4   : > { %v1066_v44 = vpop.eup %1065  ;;  %1077 = vpow2.f32 %v488_v26  ;;  %v490_v51 = vmul.f32 1.442695, %v445_v39  ;;  %v404_v52 = vpop.f32.mrf.mxu2  ;;  %v610_v20 = vmul.f32 %v1064_v40, %v1346_v6 }
  0xc5   : > { %v1413_v46 = vpop.eup %1067  ;;  %v547_v47 = vadd.f32 1.0, %v1066_v44  ;;  %1079 = vpow2.f32 %v504_v37  ;;  %v424_v55 = vpop.f32.mrf.mxu3  ;;  %v1417_v21 = vadd.f32 %v1303_v18, %v404_v52 }
  0xc6   : > { %v1070_v57 = vpop.eup %1069  ;;  %1081 = vpow2.f32 %v520_v43  ;;  %v1420_v59 = vadd.f32 %v1303_v18, %v424_v55  ;;  %v367_v60 = vpop.f32.mrf.mxu0 }
  0xc7   : > { %v387_v61 = vpop.f32.mrf.mxu1  ;;  %v1072_v62 = vpop.eup %1071  ;;  %v595_v63 = vmul.f32 %v1070_v57, %v1352_v12  ;;  %1083 = vrcp.f32 %v547_v47  ;;  %v1424_v33 = vadd.f32 %v1303_v18, %v367_v60  ;;  %v453_v2 = vsub.f32 0.0, %v1417_v21 }
  0xc8   : > { %v1427_v0 = vadd.f32 %v1303_v18, %v387_v61  ;;  %v1074_v53 = vpop.eup %1073  ;;  %v555_v1 = vadd.f32 1.0, %v1072_v62  ;;  %1085 = vpow2.f32 %v474_v45  ;;  %v461_v3 = vsub.f32 0.0, %v1420_v59 }
  0xc9   : > { %v1076_v4 = vpop.eup %1075  ;;  %v883_v22 = vpack.c.bf16 %v595_v63, %v594_v58  ;;  %v532_v34 = vadd.f32 1.0, %v1074_v53  ;;  %1087 = vpow2.f32 %v490_v51  ;;  %v438_v12 = vsub.f32 0.0, %v1424_v33 }
  0xca   : > { %v1078_v5 = vpop.eup %1077  ;;  %v603_v29 = vmul.f32 %v1076_v4, %v1355_v13  ;;  %1089 = vrcp.f32 %v555_v1  ;;  %v506_v9 = vmul.f32 1.442695, %v453_v2  ;;  %v446_v14 = vsub.f32 0.0, %v1427_v0 }
  0xcb   : > { %v1080_v10 = vpop.eup %1079  ;;  %955 = vst [vmem:[%s1388_s8 + $0x8] sm:$0xff] %v883_v22   ;;  %1091 = vrcp.f32 %v532_v34  ;;  %v540_v11 = vadd.f32 1.0, %v1078_v5  ;;  %v522_v48 = vmul.f32 1.442695, %v461_v3  ;;  %v476_v54 = vmul.f32 1.442695, %v438_v12 }
  0xcc   : > { %v1082_v30 = vpop.eup %1081  ;;  %v903_v15 = vpack.c.bf16 %v603_v29, %v602_v8  ;;  %v548_v16 = vadd.f32 1.0, %v1080_v10  ;;  %1093 = vpow2.f32 %v506_v9  ;;  %v407_v13 = vpop.f32.mrf.mxu2  ;;  %v492_v31 = vmul.f32 1.442695, %v446_v14 }
  0xcd   : > { %v1084_v19 = vpop.eup %1083  ;;  %1095 = vrcp.f32 %v540_v11  ;;  %v427_v25 = vpop.f32.mrf.mxu3  ;;  %v1440_v32 = vadd.f32 %v1303_v18, %v407_v13  ;;  %v618_v47 = vmul.f32 %v1413_v46, %v1349_v7  ;;  %v556_v57 = vadd.f32 1.0, %v1082_v30 }
  0xce   : > { %v1086_v26 = vpop.eup %1085  ;;  %959 = vst [vmem:[%s1388_s8 + $0x28] sm:$0xff] %v903_v15   ;;  %v611_v27 = vmul.f32 %v1084_v19, %v1367_v41  ;;  %1097 = vrcp.f32 %v548_v16  ;;  %v369_v49 = vpop.f32.mrf.mxu0  ;;  %v1443_v6 = vadd.f32 %v1303_v18, %v427_v25 }
  0xcf   : > { %v389_v35 = vpop.f32.mrf.mxu1  ;;  %v1088_v36 = vpop.eup %1087  ;;  %v533_v37 = vadd.f32 1.0, %v1086_v26  ;;  %v1446_v38 = vadd.f32 %v1303_v18, %v369_v49  ;;  %1099 = vpow2.f32 %v522_v48  ;;  %v454_v44 = vsub.f32 0.0, %v1440_v32 }
  0xd0   : > { %v1449_v39 = vadd.f32 %v1303_v18, %v389_v35  ;;  %v1090_v41 = vpop.eup %1089  ;;  %v923_v40 = vpack.c.bf16 %v611_v27, %v610_v20  ;;  %v541_v43 = vadd.f32 1.0, %v1088_v36  ;;  %v462_v7 = vsub.f32 0.0, %v1443_v6 }
  0xd1   : > { %v1092_v45 = vpop.eup %1091  ;;  %v619_v51 = vmul.f32 %v1090_v41, %v1370_v42  ;;  %1101 = vrcp.f32 %v533_v37  ;;  %v439_v52 = vsub.f32 0.0, %v1446_v38  ;;  %v508_v63 = vmul.f32 1.442695, %v454_v44 }
  0xd2   : > { %v1094_v55 = vpop.eup %1093  ;;  %963 = vst [vmem:[%s1388_s8 + $0x48] sm:$0xff] %v923_v40   ;;  %1103 = vrcp.f32 %v541_v43  ;;  %v447_v58 = vsub.f32 0.0, %v1449_v39  ;;  %v596_v12 = vmul.f32 %v1092_v45, %v1374_v50  ;;  %v524_v9 = vmul.f32 1.442695, %v462_v7 }
  0xd3   : > { %v1096_v60 = vpop.eup %1095  ;;  %v943_v61 = vpack.c.bf16 %v619_v51, %v618_v47  ;;  %v549_v62 = vadd.f32 1.0, %v1094_v55  ;;  %1105 = vpow2.f32 %v476_v54  ;;  %v478_v42 = vmul.f32 1.442695, %v439_v52 }
  0xd4   : > { %v1098_v53 = vpop.eup %1097  ;;  %1107 = vpow2.f32 %v492_v31  ;;  %v409_v46 = vpop.f32.mrf.mxu2  ;;  %v494_v3 = vmul.f32 1.442695, %v447_v58  ;;  %v604_v14 = vmul.f32 %v1096_v60, %v1379_v56 }
  0xd5   : > { %967 = vst [vmem:[%s1388_s8 + $0x68] sm:$0xff] %v943_v61   ;;  %1109 = vrcp.f32 %v549_v62  ;;  %v429_v1 = vpop.f32.mrf.mxu3  ;;  %v1100_v2 = vpop.eup %1099  ;;  %v1461_v4 = vadd.f32 %v1303_v18, %v409_v46  ;;  %v612_v54 = vmul.f32 %v1098_v53, %v1395_v17 }
  0xd6   : > { %1111 = vrcp.f32 %v556_v57  ;;  %v1464_v22 = vadd.f32 %v1303_v18, %v429_v1  ;;  %v557_v5 = vadd.f32 1.0, %v1100_v2 }
  0xd7   : > { %v1102_v34 = vpop.eup %1101  ;;  %1113 = vpow2.f32 %v508_v63  ;;  %v455_v10 = vsub.f32 0.0, %v1461_v4 }
  0xd8   : > { %v1104_v8 = vpop.eup %1103  ;;  %v597_v29 = vmul.f32 %v1102_v34, %v1402_v24  ;;  %1115 = vpow2.f32 %v478_v42  ;;  %v463_v16 = vsub.f32 0.0, %v1464_v22 }
  0xd9   : > { %v1106_v11 = vpop.eup %1105  ;;  %v605_v30 = vmul.f32 %v1104_v8, %v1407_v28  ;;  %1117 = vrcp.f32 %v557_v5  ;;  %v510_v50 = vmul.f32 1.442695, %v455_v10 }
  0xda   : > { %v1108_v18 = vpop.eup %1107  ;;  %v888_v15 = vpack.c.bf16 %v597_v29, %v596_v12  ;;  %1119 = vpow2.f32 %v494_v3  ;;  %v534_v19 = vadd.f32 1.0, %v1106_v11  ;;  %v526_v27 = vmul.f32 1.442695, %v463_v16 }
  0xdb   : > { %v1110_v48 = vpop.eup %1109  ;;  %v908_v24 = vpack.c.bf16 %v605_v30, %v604_v14  ;;  %v542_v13 = vadd.f32 1.0, %v1108_v18  ;;  %1121 = vpow2.f32 %v524_v9 }
  0xdc   : > { %v1112_v20 = vpop.eup %1111  ;;  %956 = vst [vmem:[%s1388_s8 + $0x10] sm:$0xff] %v888_v15   ;;  %v613_v56 = vmul.f32 %v1110_v48, %v1417_v21  ;;  %1123 = vpow2.f32 %v510_v50 }
  0xdd   : > { %v1114_v28 = vpop.eup %1113  ;;  %960 = vst [vmem:[%s1388_s8 + $0x30] sm:$0xff] %v908_v24   ;;  %1125 = vrcp.f32 %v534_v19  ;;  %v620_v36 = vmul.f32 %v1112_v20, %v1399_v23 }
  0xde   : > { %v1116_v25 = vpop.eup %1115  ;;  %v928_v26 = vpack.c.bf16 %v613_v56, %v612_v54  ;;  %1127 = vrcp.f32 %v542_v13  ;;  %v550_v21 = vadd.f32 1.0, %v1114_v28 }
  0xdf   : > { %v1118_v31 = vpop.eup %1117  ;;  %v535_v49 = vadd.f32 1.0, %v1116_v25 }
  0xe0   : > { %v1120_v35 = vpop.eup %1119  ;;  %964 = vst [vmem:[%s1388_s8 + $0x50] sm:$0xff] %v928_v26   ;;  %v621_v17 = vmul.f32 %v1118_v31, %v1420_v59 }
  0xe1   : > { %1129 = vrcp.f32 %v535_v49  ;;  %v543_v37 = vadd.f32 1.0, %v1120_v35  ;;  %v1122_v41 = vpop.eup %1121 }
  0xe2   : > { %v948_v40 = vpack.c.bf16 %v621_v17, %v620_v36  ;;  %1131 = vpow2.f32 %v526_v27  ;;  %v1124_v43 = vpop.eup %1123  ;;  %v558_v45 = vadd.f32 1.0, %v1122_v41 }
  0xe3   : > { %1133 = vrcp.f32 %v543_v37  ;;  %v1126_v44 = vpop.eup %1125  ;;  %v551_v47 = vadd.f32 1.0, %v1124_v43 }
  0xe4   : > { %968 = vst [vmem:[%s1388_s8 + $0x70] sm:$0xff] %v948_v40   ;;  %1135 = vrcp.f32 %v550_v21  ;;  %v1128_v23 = vpop.eup %1127  ;;  %v598_v52 = vmul.f32 %v1126_v44, %v1424_v33 }
  0xe5   : > { %1137 = vrcp.f32 %v551_v47  ;;  %v606_v60 = vmul.f32 %v1128_v23, %v1427_v0 }
  0xe6   : > { %1139 = vrcp.f32 %v558_v45 }
  0xe7   : > { %v1130_v51 = vpop.eup %1129 }
  0xe8   : > { %v1132_v59 = vpop.eup %1131  ;;  %v599_v55 = vmul.f32 %v1130_v51, %v1446_v38 }
  0xe9   : > { %v1134_v57 = vpop.eup %1133  ;;  %v559_v58 = vadd.f32 1.0, %v1132_v59 }
  0xea   : > { %v893_v61 = vpack.c.bf16 %v599_v55, %v598_v52  ;;  %v607_v62 = vmul.f32 %v1134_v57, %v1449_v39  ;;  %v1136_v63 = vpop.eup %1135 }
  0xeb   : > { %1141 = vrcp.f32 %v559_v58  ;;  %v1138_v7 = vpop.eup %1137  ;;  %v614_v33 = vmul.f32 %v1136_v63, %v1440_v32 }
  0xec   : > { %957 = vst [vmem:[%s1388_s8 + $0x18] sm:$0xff] %v893_v61   ;;  %v913_v53 = vpack.c.bf16 %v607_v62, %v606_v60  ;;  %v615_v0 = vmul.f32 %v1138_v7, %v1461_v4  ;;  %v1140_v38 = vpop.eup %1139 }
  0xed   : > { %v622_v46 = vmul.f32 %v1140_v38, %v1443_v6 }
  0xee   : > { %961 = vst [vmem:[%s1388_s8 + $0x38] sm:$0xff] %v913_v53   ;;  %v933_v39 = vpack.c.bf16 %v615_v0, %v614_v33 }
  0xf0   : > { %965 = vst [vmem:[%s1388_s8 + $0x58] sm:$0xff] %v933_v39  }
  0xf1   : > { %v1142_v42 = vpop.eup %1141 }
  0xf2   : > { %v623_v1 = vmul.f32 %v1142_v42, %v1464_v22 }
  0xf4   : > { %v953_v2 = vpack.c.bf16 %v623_v1, %v622_v46 }
  0xf6   : > { %969 = vst [vmem:[%s1388_s8 + $0x78] sm:$0xff] %v953_v2  }
  0xf7   : > { %1170 = shalt.err (!%p1167_p3)
}
  0xf8   : > { %s1207_s4 = smov 64   ;;  %s1208_s5 = smov 4  }
  0xf9   : > { %973 = dma.vmem_to_hbm [thread:$0]  (%p1267_p5), %s702_s16, 2048, %s704_s19, %s689_s20, %s1207_s4, %s1207_s4, %s1208_s5  }
  0xfa PF: > { %p979_p4 = scmp.ge.s32.totalorder %s1205_s15, 2  ;;  %s718_s6 = sand.u32 1, %s1193_s12  }
  0xfb   : > { %s719_s7 = scalar_lea.sflag [#allocation3], %s718_s6 }
  0xfc   : > { %p976_p7 = pnand %p979_p4, %p1271_p6 }
  0xfe   : > { %p977_p8 = pneg %p976_p7 }
 0x100   : > { %1188 = dma.done.wait (%p977_p8), %s719_s7, 2048  }
 0x101   : > { %1190 = vsyncadd (%p977_p8), %s719_s7, 4294965248  ;;  %p13_p9 = scmp.ge.s32.totalorder %s1254_s18, 4   ;;  %s1532_s12 = smov %s1197_s13 }
 0x102   : > { %s1533_s13 = smov %s1201_s14  ;;  %s1534_s14 = smov %s1265_s21 }
 0x103   : > { %s1535_s15 = smov %s1254_s18  ;;  %15 = sbr.rel (!%p13_p9) target bundleno = 3 (0x3), region = 67 }
 0x108   :  { %725 = vsyncpa [#allocation3], 1 }
 0x109   :  { %727 = vsyncpa [#allocation3 + $0x1], 1 }

</bundles_post_ra>
